<compile_context>
chip_gen: v5e
topology: v5e:2x2
jax: 0.10.0
libtpu: 0.0.40
codegen_flags: <defaults>
</compile_context>

<pallas_src>
import functools

import jax
import jax.numpy as jnp
from jax import lax
from jax.experimental import pallas as pl
from jax.experimental.pallas import tpu as pltpu

BN_EPS = 1e-5
LEAKY_SLOPE = 0.01


def _round_up(n, m):
    return ((n + m - 1) // m) * m


def _vmem_capacity_bytes():
    """Physical VMEM per TensorCore; conservative fallback if query fails."""
    try:
        info = pltpu.get_tpu_info()
        cap = getattr(info, "vmem_capacity_bytes", None)
        if cap:
            return int(cap)
    except Exception:
        pass
    return 64 * 1024 * 1024  # v7x per-TC VMEM (smallest of v5e/v6e/v7x)


# ---------------------------------------------------------------------------
# Fused single-invocation kernel: whole batch resident in VMEM.
# BN stats (centered variance) + folded affine + Linear + LeakyReLU + Linear.
# ---------------------------------------------------------------------------
def fused_kernel(x_ref, gamma_ref, beta_ref, w1t_ref, b1_ref, w2t_ref, b2_ref,
                 o_ref):
    x = x_ref[...].astype(jnp.float32)                    # (B, F)

    # Training-mode BatchNorm1d: batch mean, biased variance (centered form).
    mean = jnp.mean(x, axis=0, keepdims=True)             # (1, F)
    xc = x - mean
    var = jnp.mean(xc * xc, axis=0, keepdims=True)
    scale = gamma_ref[...] * lax.rsqrt(var + BN_EPS)
    xn = xc * scale + beta_ref[...]

    # backbone: Linear (pre-transposed weight, no in-kernel XLU transpose) + LeakyReLU.
    h = jnp.dot(xn, w1t_ref[...], preferred_element_type=jnp.float32) + b1_ref[...]
    h = jnp.where(h > 0, h, LEAKY_SLOPE * h)

    # classifier_head: Linear into a lane-dense (128-padded) output slab.
    out = jnp.dot(h, w2t_ref[...], preferred_element_type=jnp.float32) + b2_ref[...]
    o_ref[...] = out.astype(o_ref.dtype)


# ---------------------------------------------------------------------------
# Tiled fallback, pass 1: BN statistics via shifted sums (no cancellation),
# with explicit row masking for the ragged last tile.
# ---------------------------------------------------------------------------
def bn_stats_kernel(x_ref, gamma_ref, beta_ref, scale_ref, shift_ref,
                    c_ref, s_ref, ss_ref, *, batch, tile_b):
    step = pl.program_id(0)

    @pl.when(step == 0)
    def _():
        # Shift point for numerically-stable variance (first row of the batch).
        c_ref[...] = x_ref[0:1, :].astype(jnp.float32)
        s_ref[...] = jnp.zeros_like(s_ref)
        ss_ref[...] = jnp.zeros_like(ss_ref)

    x = x_ref[...].astype(jnp.float32)                    # (TB, F)
    row = lax.broadcasted_iota(jnp.int32, x.shape, 0) + step * tile_b
    valid = row < batch                                   # mask ragged last tile
    xc = jnp.where(valid, x - c_ref[...], 0.0)

    s_ref[...] += jnp.sum(xc, axis=0, keepdims=True)
    ss_ref[...] += jnp.sum(xc * xc, axis=0, keepdims=True)

    @pl.when(step == pl.num_programs(0) - 1)
    def _():
        inv_b = jnp.float32(1.0 / batch)
        m_s = s_ref[...] * inv_b                          # E[x - c]
        var = jnp.maximum(ss_ref[...] * inv_b - m_s * m_s, 0.0)
        mean = c_ref[...] + m_s
        scale = gamma_ref[...] * lax.rsqrt(var + BN_EPS)
        scale_ref[...] = scale
        shift_ref[...] = beta_ref[...] - mean * scale


# ---------------------------------------------------------------------------
# Tiled fallback, pass 2: folded BN affine -> Linear -> LeakyReLU -> Linear.
# ---------------------------------------------------------------------------
def forward_kernel(x_ref, scale_ref, shift_ref, w1t_ref, b1_ref,
                   w2t_ref, b2_ref, o_ref):
    x = x_ref[...].astype(jnp.float32)
    xn = x * scale_ref[...] + shift_ref[...]
    h = jnp.dot(xn, w1t_ref[...], preferred_element_type=jnp.float32) + b1_ref[...]
    h = jnp.where(h > 0, h, LEAKY_SLOPE * h)
    out = jnp.dot(h, w2t_ref[...], preferred_element_type=jnp.float32) + b2_ref[...]
    o_ref[...] = out.astype(o_ref.dtype)


# ---------------------------------------------------------------------------
# Wrapper.
# ---------------------------------------------------------------------------
def elasticnet_forward(x, gamma, beta, w1, b1, w2, b2, *,
                       tile_b=512, max_fused_vmem_bytes=None):
    B, F = x.shape
    O = w2.shape[0]
    Op = _round_up(O, 128)                                # lane-dense output width
    f32 = jnp.float32

    x = x.astype(f32)
    gamma_r = gamma.astype(f32).reshape(1, F)
    beta_r = beta.astype(f32).reshape(1, F)
    w1t = w1.T.astype(f32)                                # (F, F) pre-transposed (in x out)
    b1_r = b1.astype(f32).reshape(1, F)
    # Only the tiny classifier weight/bias are padded (keeps output stores lane-dense).
    w2t_p = jnp.zeros((F, Op), f32).at[:, :O].set(w2.T.astype(f32))
    b2_p = jnp.zeros((1, Op), f32).at[0, :O].set(b2.astype(f32))

    cap = _vmem_capacity_bytes()
    fused_budget = (max_fused_vmem_bytes if max_fused_vmem_bytes is not None
                    else int(0.5 * cap))

    # Rough VMEM need of the fused kernel (x, xn/h intermediates, padded out, weights).
    fused_bytes = 4 * (3 * B * F + 2 * B * Op + F * F + F * Op + 4 * F + 2 * Op)

    if fused_bytes <= fused_budget:
        # --- Fused single pass: whole batch resident, one kernel launch. ---
        vmem_limit = int(min(0.9 * cap, max(2 * fused_bytes + (8 << 20), 32 << 20)))
        out_p = pl.pallas_call(
            fused_kernel,
            out_shape=jax.ShapeDtypeStruct((B, Op), f32),
            compiler_params=pltpu.CompilerParams(vmem_limit_bytes=vmem_limit),
        )(x, gamma_r, beta_r, w1t, b1_r, w2t_p, b2_p)
        return out_p[:, :O]

    # --- Tiled two-pass fallback for large batches. ---
    TB = _round_up(max(8, min(tile_b, _round_up(B, 8))), 8)
    nb = pl.cdiv(B, TB)

    # Pass 1: BN statistics -> folded scale/shift (reduction over the batch).
    scale, shift = pl.pallas_call(
        functools.partial(bn_stats_kernel, batch=B, tile_b=TB),
        out_shape=(jax.ShapeDtypeStruct((1, F), f32),
                   jax.ShapeDtypeStruct((1, F), f32)),
        grid_spec=pltpu.PrefetchScalarGridSpec(
            num_scalar_prefetch=0,
            grid=(nb,),
            in_specs=[pl.BlockSpec((TB, F), lambda i: (i, 0)),
                      pl.BlockSpec((1, F), lambda i: (0, 0)),
                      pl.BlockSpec((1, F), lambda i: (0, 0))],
            out_specs=[pl.BlockSpec((1, F), lambda i: (0, 0)),
                       pl.BlockSpec((1, F), lambda i: (0, 0))],
            scratch_shapes=[pltpu.VMEM((1, F), f32),
                            pltpu.VMEM((1, F), f32),
                            pltpu.VMEM((1, F), f32)]),
        compiler_params=pltpu.CompilerParams(
            dimension_semantics=("arbitrary",)),
    )(x, gamma_r, beta_r)

    # Pass 2: batch-tiled fused forward; batch axis "parallel" (megacore sharding).
    # VMEM budget: x/out tiles double-buffered, weights assumed double-buffered
    # (conservative), plus intermediates.
    est = 4 * (2 * TB * F + 2 * TB * Op + 3 * TB * F
               + 2 * (F * F + F * Op) + 8 * F + 4 * Op)
    vmem_limit = int(min(0.9 * cap, max(est + (8 << 20), 32 << 20)))
    # TODO(synk): for very large F, add a K-tiling grid axis with an f32
    # accumulator (init/finalize via pl.when) and single-buffer the
    # grid-invariant weight specs so the resident-weight footprint fits
    # v7x's 64 MiB VMEM; optionally cast matmul operands to bf16 on v6e/v7x.

    out_p = pl.pallas_call(
        forward_kernel,
        out_shape=jax.ShapeDtypeStruct((B, Op), f32),
        grid_spec=pltpu.PrefetchScalarGridSpec(
            num_scalar_prefetch=0,
            grid=(nb,),
            in_specs=[pl.BlockSpec((TB, F), lambda i: (i, 0)),
                      pl.BlockSpec((1, F), lambda i: (0, 0)),
                      pl.BlockSpec((1, F), lambda i: (0, 0)),
                      pl.BlockSpec((F, F), lambda i: (0, 0)),
                      pl.BlockSpec((1, F), lambda i: (0, 0)),
                      pl.BlockSpec((F, Op), lambda i: (0, 0)),
                      pl.BlockSpec((1, Op), lambda i: (0, 0))],
            out_specs=pl.BlockSpec((TB, Op), lambda i: (i, 0))),
        compiler_params=pltpu.CompilerParams(
            dimension_semantics=("parallel",),
            vmem_limit_bytes=vmem_limit),
    )(x, scale, shift, w1t, b1_r, w2t_p, b2_p)

    return out_p[:, :O]


# ---------------------------------------------------------------------------
# Parameter init / reference.
# ---------------------------------------------------------------------------
def init_params(key, in_feats, out_feats):
    """Deterministic synthetic parameter init (PyTorch-shaped)."""
    k1, k2, k3, k4 = jax.random.split(key, 4)
    # BatchNorm1d affine params: gamma=1, beta=0 at construction.
    gamma = jnp.ones((in_feats,), jnp.float32)
    beta = jnp.zeros((in_feats,), jnp.float32)
    bound1 = 1.0 / jnp.sqrt(in_feats)
    w1 = jax.random.uniform(k1, (in_feats, in_feats), jnp.float32, -bound1, bound1)
    b1 = jax.random.uniform(k2, (in_feats,), jnp.float32, -bound1, bound1)
    w2 = jax.random.uniform(k3, (out_feats, in_feats), jnp.float32, -bound1, bound1)
    b2 = jax.random.uniform(k4, (out_feats,), jnp.float32, -bound1, bound1)
    return gamma, beta, w1, b1, w2, b2


def reference_forward(x, gamma, beta, w1, b1, w2, b2):
    """Pure-JAX reference of the PyTorch forward (training-mode BN)."""
    mean = jnp.mean(x, axis=0, keepdims=True)
    var = jnp.mean((x - mean) ** 2, axis=0, keepdims=True)
    xn = (x - mean) / jnp.sqrt(var + BN_EPS) * gamma + beta
    h = xn @ w1.T + b1
    h = jnp.where(h > 0, h, LEAKY_SLOPE * h)
    return h @ w2.T + b2


if __name__ == "__main__":
    B, in_feats, out_feats = 256, 32, 1

    key = jax.random.PRNGKey(0)
    kx, kp = jax.random.split(key)
    x = jax.random.normal(kx, (B, in_feats), jnp.float32)
    gamma, beta, w1, b1, w2, b2 = init_params(kp, in_feats, out_feats)

    # Fused single-pass path (whole batch resident in VMEM).
    out = jax.block_until_ready(elasticnet_forward(x, gamma, beta, w1, b1, w2, b2))
    ref = reference_forward(x, gamma, beta, w1, b1, w2, b2)
    assert out.shape == (B, out_feats), out.shape
    assert jnp.allclose(out, ref, atol=1e-4, rtol=1e-4), (
        f"fused max abs err {jnp.max(jnp.abs(out - ref))}")

    # Tiled two-pass path (forced): non-centered data + ragged last tile exercise
    # the shifted-variance numerics and the boundary row masking.
    B2 = 200
    x2 = jax.random.normal(jax.random.PRNGKey(1), (B2, in_feats), jnp.float32) * 3.0 + 5.0
    out2 = jax.block_until_ready(
        elasticnet_forward(x2, gamma, beta, w1, b1, w2, b2,
                           tile_b=64, max_fused_vmem_bytes=1))
    ref2 = reference_forward(x2, gamma, beta, w1, b1, w2, b2)
    assert out2.shape == (B2, out_feats), out2.shape
    assert jnp.allclose(out2, ref2, atol=1e-4, rtol=1e-4), (
        f"tiled max abs err {jnp.max(jnp.abs(out2 - ref2))}")

    print("KERNEL_OK")
</pallas_src>

<mosaic_0001>
module attributes {stable_mosaic.version = 11 : i64} {
  func.func @fused_kernel(%arg0: memref<256x32xf32, #tpu.memory_space<vmem>>, %arg1: memref<1x32xf32, #tpu.memory_space<vmem>>, %arg2: memref<1x32xf32, #tpu.memory_space<vmem>>, %arg3: memref<32x32xf32, #tpu.memory_space<vmem>>, %arg4: memref<1x32xf32, #tpu.memory_space<vmem>>, %arg5: memref<32x128xf32, #tpu.memory_space<vmem>>, %arg6: memref<1x128xf32, #tpu.memory_space<vmem>>, %arg7: memref<256x128xf32, #tpu.memory_space<vmem>>) attributes {dimension_semantics = [], scalar_prefetch = 0 : i64, scratch_operands = 0 : i64, tpu.core_type = #tpu.core_type<tc>} {
    %c0 = arith.constant 0 : index
    %c0_0 = arith.constant 0 : index
    %0 = vector.load %arg0[%c0, %c0_0] : memref<256x32xf32, #tpu.memory_space<vmem>>, vector<256x32xf32>
    %cst = arith.constant dense<0.000000e+00> : vector<32xf32>
    %1 = vector.multi_reduction <add>, %0, %cst [0] : vector<256x32xf32> to vector<32xf32>
    %2 = vector.shape_cast %1 : vector<32xf32> to vector<1x32xf32>
    %cst_1 = arith.constant 2.560000e+02 : f32
    %3 = vector.broadcast %cst_1 : f32 to vector<1x32xf32>
    %4 = arith.divf %2, %3 : vector<1x32xf32>
    %5 = vector.broadcast %4 : vector<1x32xf32> to vector<256x32xf32>
    %6 = arith.subf %0, %5 : vector<256x32xf32>
    %7 = arith.mulf %6, %6 : vector<256x32xf32>
    %cst_2 = arith.constant dense<0.000000e+00> : vector<32xf32>
    %8 = vector.multi_reduction <add>, %7, %cst_2 [0] : vector<256x32xf32> to vector<32xf32>
    %9 = vector.shape_cast %8 : vector<32xf32> to vector<1x32xf32>
    %cst_3 = arith.constant 2.560000e+02 : f32
    %10 = vector.broadcast %cst_3 : f32 to vector<1x32xf32>
    %11 = arith.divf %9, %10 : vector<1x32xf32>
    %c0_4 = arith.constant 0 : index
    %c0_5 = arith.constant 0 : index
    %12 = vector.load %arg1[%c0_4, %c0_5] : memref<1x32xf32, #tpu.memory_space<vmem>>, vector<1x32xf32>
    %cst_6 = arith.constant 9.99999974E-6 : f32
    %13 = vector.broadcast %cst_6 : f32 to vector<1x32xf32>
    %14 = arith.addf %11, %13 : vector<1x32xf32>
    %15 = math.rsqrt %14 : vector<1x32xf32>
    %16 = arith.mulf %12, %15 : vector<1x32xf32>
    %17 = vector.broadcast %16 : vector<1x32xf32> to vector<256x32xf32>
    %18 = arith.mulf %6, %17 : vector<256x32xf32>
    %c0_7 = arith.constant 0 : index
    %c0_8 = arith.constant 0 : index
    %19 = vector.load %arg2[%c0_7, %c0_8] : memref<1x32xf32, #tpu.memory_space<vmem>>, vector<1x32xf32>
    %20 = vector.broadcast %19 : vector<1x32xf32> to vector<256x32xf32>
    %21 = arith.addf %18, %20 : vector<256x32xf32>
    %c0_9 = arith.constant 0 : index
    %c0_10 = arith.constant 0 : index
    %22 = vector.load %arg3[%c0_9, %c0_10] : memref<32x32xf32, #tpu.memory_space<vmem>>, vector<32x32xf32>
    %cst_11 = arith.constant dense<0.000000e+00> : vector<256x32xf32>
    %23 = tpu.matmul %21, %22, %cst_11 {dimension_numbers = #tpu.dot_dimension_numbers<[1], [0], [0], [1], [0, 0, 1, 1], [], []>} : vector<256x32xf32>, vector<32x32xf32>, vector<256x32xf32> -> vector<256x32xf32>
    %c0_12 = arith.constant 0 : index
    %c0_13 = arith.constant 0 : index
    %24 = vector.load %arg4[%c0_12, %c0_13] : memref<1x32xf32, #tpu.memory_space<vmem>>, vector<1x32xf32>
    %25 = vector.broadcast %24 : vector<1x32xf32> to vector<256x32xf32>
    %26 = arith.addf %23, %25 : vector<256x32xf32>
    %cst_14 = arith.constant 0.000000e+00 : f32
    %27 = vector.broadcast %cst_14 : f32 to vector<256x32xf32>
    %28 = arith.cmpf ogt, %26, %27 : vector<256x32xf32>
    %cst_15 = arith.constant 0.00999999977 : f32
    %29 = vector.broadcast %cst_15 : f32 to vector<256x32xf32>
    %30 = arith.mulf %29, %26 : vector<256x32xf32>
    %31 = arith.select %28, %26, %30 : vector<256x32xi1>, vector<256x32xf32>
    %c0_16 = arith.constant 0 : index
    %c0_17 = arith.constant 0 : index
    %32 = vector.load %arg5[%c0_16, %c0_17] : memref<32x128xf32, #tpu.memory_space<vmem>>, vector<32x128xf32>
    %cst_18 = arith.constant dense<0.000000e+00> : vector<256x128xf32>
    %33 = tpu.matmul %31, %32, %cst_18 {dimension_numbers = #tpu.dot_dimension_numbers<[1], [0], [0], [1], [0, 0, 1, 1], [], []>} : vector<256x32xf32>, vector<32x128xf32>, vector<256x128xf32> -> vector<256x128xf32>
    %c0_19 = arith.constant 0 : index
    %c0_20 = arith.constant 0 : index
    %34 = vector.load %arg6[%c0_19, %c0_20] : memref<1x128xf32, #tpu.memory_space<vmem>>, vector<1x128xf32>
    %35 = vector.broadcast %34 : vector<1x128xf32> to vector<256x128xf32>
    %36 = arith.addf %33, %35 : vector<256x128xf32>
    %c0_21 = arith.constant 0 : index
    %c0_22 = arith.constant 0 : index
    %37 = vector.load %arg7[%c0_21, %c0_22] : memref<256x128xf32, #tpu.memory_space<vmem>>, vector<256x128xf32>
    tpu.vector_store %arg7[%c0_21, %c0_22], %36 {strides = array<i32>} : memref<256x128xf32, #tpu.memory_space<vmem>>, vector<256x128xf32>,
    return
  }
}

</mosaic_0001>

<bundles_post_ra>
// kernel: tpu_custom_call.1
= control target key start
LH: loop header
LB: loop body
LE: loop exit
PB: predicated region body
PF: predicated region fallthrough
CT: control target
= control target key end

     0   :  { %vm59_vm0 = vcmask 261120   ;;  %s1813_s0 = inlined_call_operand.vmem [shape: f32[256,32], index: 0, kind: input, shape index: {}]   ;;  %s1814_s1 = inlined_call_operand.vmem [shape: f32[1,32], index: 1, kind: input, shape index: {}]   ;;  %s1815_s2 = inlined_call_operand.vmem [shape: f32[1,32], index: 2, kind: input, shape index: {}]   ;;  %s1816_s3 = inlined_call_operand.vmem [shape: f32[32,32], index: 3, kind: input, shape index: {}]   ;;  %s1817_s4 = inlined_call_operand.vmem [shape: f32[1,32], index: 4, kind: input, shape index: {}]   ;;  %s1818_s5 = inlined_call_operand.vmem [shape: f32[32,128], index: 5, kind: input, shape index: {}]   ;;  %s1819_s6 = inlined_call_operand.vmem [shape: f32[1,128], index: 6, kind: input, shape index: {}]   ;;  %s1820_s7 = inlined_call_operand.hbm [shape: f32[256,128], index: 7, kind: output, shape index: {}]  }
   0x1   :  { %v358_v0 = vld [vmem:[%s1816_s3 + $0x18] sm:$0xff]  ;;  %v357_v1 = vld [vmem:[%s1816_s3 + $0x10] sm:$0xff]  ;;  %v1097_v2 = vld [vmem:[%s1813_s0] sm:$0xff] }
   0x2   :  { %999 = vmatpush.msra.mxu2 %v358_v0  ;;  %v1102_v3 = vld [vmem:[%s1813_s0 + $0x8] sm:$0xff]  ;;  %471 = vmatpush.msra.mxu0 %v358_v0  ;;  %v1110_v5 = vld [vmem:[%s1813_s0 + $0x10] sm:$0xff]  ;;  %v1115_v6 = vld [vmem:[%s1813_s0 + $0x18] sm:$0xff]  ;;  %v60_v7 = vsel %vm59_vm0, %v1097_v2, 0.0 }
   0x3   :  { %v356_v4 = vld [vmem:[%s1816_s3 + $0x8] sm:$0xff]  ;;  %v61_v8 = vsel %vm59_vm0, %v1102_v3, 0.0  ;;  %v1124_v9 = vld [vmem:[%s1813_s0 + $0x20] sm:$0xff]  ;;  %v63_v11 = vsel %vm59_vm0, %v1110_v5, 0.0  ;;  %v65_v13 = vsel %vm59_vm0, %v1115_v6, 0.0  ;;  %v1143_v17 = vld [vmem:[%s1813_s0 + $0x30] sm:$0xff] }
   0x4   :  { %1000 = vmatpush.msra.mxu2 %v357_v1  ;;  %v62_v10 = vadd.f32 %v61_v8, %v60_v7  ;;  %472 = vmatpush.msra.mxu0 %v357_v1  ;;  %v355_v12 = vld [vmem:[%s1816_s3] sm:$0xff]  ;;  %v1136_v14 = vld [vmem:[%s1813_s0 + $0x28] sm:$0xff]  ;;  %v67_v16 = vsel %vm59_vm0, %v1124_v9, 0.0  ;;  %v1148_v19 = vld [vmem:[%s1813_s0 + $0x38] sm:$0xff]  ;;  %v71_v22 = vsel %vm59_vm0, %v1143_v17, 0.0 }
   0x5   :  { %v69_v20 = vsel %vm59_vm0, %v1136_v14, 0.0  ;;  %v1157_v23 = vld [vmem:[%s1813_s0 + $0x40] sm:$0xff]  ;;  %v73_v25 = vsel %vm59_vm0, %v1148_v19, 0.0  ;;  %v1164_v26 = vld [vmem:[%s1813_s0 + $0x48] sm:$0xff] }
   0x6   :  { %1001 = vmatpush.msra.mxu2 %v356_v4  ;;  %v64_v15 = vadd.f32 %v63_v11, %v62_v10  ;;  %473 = vmatpush.msra.mxu0 %v356_v4 }
   0x8   :  { %1002 = vmatpush.msra.mxu2 %v355_v12  ;;  %v66_v18 = vadd.f32 %v65_v13, %v64_v15  ;;  %474 = vmatpush.msra.mxu0 %v355_v12 }
   0xa   :  { %v68_v21 = vadd.f32 %v67_v16, %v66_v18 }
   0xc   :  { %v70_v24 = vadd.f32 %v69_v20, %v68_v21 }
   0xe   :  { %v72_v27 = vadd.f32 %v71_v22, %v70_v24 }
   0xf   :  { %12 = vsyncpa [#allocation3], 0  ;;  %v75_v28 = vsel %vm59_vm0, %v1157_v23, 0.0  ;;  %v1171_v29 = vld [vmem:[%s1813_s0 + $0x50] sm:$0xff]  ;;  %v77_v31 = vsel %vm59_vm0, %v1164_v26, 0.0  ;;  %v1178_v32 = vld [vmem:[%s1813_s0 + $0x58] sm:$0xff] }
  0x10   :  { %v74_v30 = vadd.f32 %v73_v25, %v72_v27  ;;  %v79_v34 = vsel %vm59_vm0, %v1171_v29, 0.0  ;;  %v1185_v35 = vld [vmem:[%s1813_s0 + $0x60] sm:$0xff]  ;;  %v81_v37 = vsel %vm59_vm0, %v1178_v32, 0.0  ;;  %v1192_v38 = vld [vmem:[%s1813_s0 + $0x68] sm:$0xff]  ;;  %v1199_v41 = vld [vmem:[%s1813_s0 + $0x70] sm:$0xff]  ;;  %s923_s15 = sshll.u32 %s1820_s7, 4  ;;  %s924_s15 = int_to_ptr.hbm [resolvable:$true] %s923_s15 }
  0x11   :  { %v83_v40 = vsel %vm59_vm0, %v1185_v35, 0.0  ;;  %v85_v43 = vsel %vm59_vm0, %v1192_v38, 0.0  ;;  %v1206_v44 = vld [vmem:[%s1813_s0 + $0x78] sm:$0xff]  ;;  %v87_v46 = vsel %vm59_vm0, %v1199_v41, 0.0  ;;  %v1213_v47 = vld [vmem:[%s1813_s0 + $0x80] sm:$0xff]  ;;  %v1220_v50 = vld [vmem:[%s1813_s0 + $0x88] sm:$0xff] }
  0x12   :  { %v76_v33 = vadd.f32 %v75_v28, %v74_v30  ;;  %v89_v49 = vsel %vm59_vm0, %v1206_v44, 0.0  ;;  %v91_v52 = vsel %vm59_vm0, %v1213_v47, 0.0  ;;  %v1227_v53 = vld [vmem:[%s1813_s0 + $0x90] sm:$0xff]  ;;  %v93_v55 = vsel %vm59_vm0, %v1220_v50, 0.0  ;;  %v1234_v56 = vld [vmem:[%s1813_s0 + $0x98] sm:$0xff]  ;;  %v1241_v59 = vld [vmem:[%s1813_s0 + $0xa0] sm:$0xff] }
  0x13   :  { %v95_v58 = vsel %vm59_vm0, %v1227_v53, 0.0  ;;  %v97_v61 = vsel %vm59_vm0, %v1234_v56, 0.0  ;;  %v1248_v62 = vld [vmem:[%s1813_s0 + $0xa8] sm:$0xff]  ;;  %v99_v0 = vsel %vm59_vm0, %v1241_v59, 0.0  ;;  %v1255_v1 = vld [vmem:[%s1813_s0 + $0xb0] sm:$0xff]  ;;  %v1262_v8 = vld [vmem:[%s1813_s0 + $0xb8] sm:$0xff] }
  0x14   :  { %v78_v36 = vadd.f32 %v77_v31, %v76_v33  ;;  %v101_v7 = vsel %vm59_vm0, %v1248_v62, 0.0  ;;  %v103_v11 = vsel %vm59_vm0, %v1255_v1, 0.0  ;;  %v1269_v12 = vld [vmem:[%s1813_s0 + $0xc0] sm:$0xff]  ;;  %v105_v15 = vsel %vm59_vm0, %v1262_v8, 0.0  ;;  %v1276_v16 = vld [vmem:[%s1813_s0 + $0xc8] sm:$0xff]  ;;  %v1283_v21 = vld [vmem:[%s1813_s0 + $0xd0] sm:$0xff] }
  0x15   :  { %v107_v20 = vsel %vm59_vm0, %v1269_v12, 0.0  ;;  %v109_v24 = vsel %vm59_vm0, %v1276_v16, 0.0  ;;  %v1290_v25 = vld [vmem:[%s1813_s0 + $0xd8] sm:$0xff]  ;;  %v111_v28 = vsel %vm59_vm0, %v1283_v21, 0.0  ;;  %v1297_v30 = vld [vmem:[%s1813_s0 + $0xe0] sm:$0xff]  ;;  %s1046_s16 = smov 128  }
  0x16   :  { %v80_v39 = vadd.f32 %v79_v34, %v78_v36  ;;  %v113_v33 = vsel %vm59_vm0, %v1290_v25, 0.0  ;;  %v1304_v34 = vld [vmem:[%s1813_s0 + $0xe8] sm:$0xff]  ;;  %s1047_s17 = smov 8  }
  0x18   :  { %v82_v42 = vadd.f32 %v81_v37, %v80_v39  ;;  %v115_v37 = vsel %vm59_vm0, %v1297_v30, 0.0  ;;  %v1311_v39 = vld [vmem:[%s1813_s0 + $0xf0] sm:$0xff] }
  0x1a   :  { %v84_v45 = vadd.f32 %v83_v40, %v82_v42  ;;  %v1044_v42 = vmov 256.0  }
  0x1b   :  { %1014 = vrcp.f32 %v1044_v42 }
  0x1c   :  { %v86_v48 = vadd.f32 %v85_v43, %v84_v45  ;;  %v117_v43 = vsel %vm59_vm0, %v1304_v34, 0.0  ;;  %v1318_v45 = vld [vmem:[%s1813_s0 + $0xf8] sm:$0xff] }
  0x1e   :  { %v88_v51 = vadd.f32 %v87_v46, %v86_v48  ;;  %v119_v48 = vsel %vm59_vm0, %v1311_v39, 0.0 }
  0x20   :  { %v90_v54 = vadd.f32 %v89_v49, %v88_v51  ;;  %v121_v51 = vsel %vm59_vm0, %v1318_v45, 0.0 }
  0x22   :  { %v92_v57 = vadd.f32 %v91_v52, %v90_v54  ;;  %v1015_v52 = vpop.eup %1014 }
  0x23   :  { %vm134_vm1 = vweird.f32 %v1015_v52 }
  0x24   :  { %v94_v60 = vadd.f32 %v93_v55, %v92_v57  ;;  %v130_v57 = vmul.f32 256.0, %v1015_v52 }
  0x26   :  { %v96_v63 = vadd.f32 %v95_v58, %v94_v60 }
  0x28   :  { %v98_v4 = vadd.f32 %v97_v61, %v96_v63  ;;  %v131_v61 = vsub.f32 1.0, %v130_v57 }
  0x2a   :  { %v100_v10 = vadd.f32 %v99_v0, %v98_v4  ;;  %v132_v4 = vmul.f32 %v1015_v52, %v131_v61 }
  0x2c   :  { %v102_v13 = vadd.f32 %v101_v7, %v100_v10  ;;  %v133_v10 = vadd.f32 %v1015_v52, %v132_v4 }
  0x2e   :  { %v104_v18 = vadd.f32 %v103_v11, %v102_v13  ;;  %v1324_v13 = vsel %vm134_vm1, %v1015_v52, %v133_v10 }
  0x30   :  { %v106_v22 = vadd.f32 %v105_v15, %v104_v18 }
  0x32   :  { %v108_v27 = vadd.f32 %v107_v20, %v106_v22 }
  0x34   :  { %v110_v31 = vadd.f32 %v109_v24, %v108_v27 }
  0x36   :  { %v112_v36 = vadd.f32 %v111_v28, %v110_v31 }
  0x38   :  { %v114_v40 = vadd.f32 %v113_v33, %v112_v36 }
  0x3a   :  { %v116_v46 = vadd.f32 %v115_v37, %v114_v40 }
  0x3c   :  { %v118_v49 = vadd.f32 %v117_v43, %v116_v46 }
  0x3e   :  { %v120_v54 = vadd.f32 %v119_v48, %v118_v49 }
  0x40   :  { %v122_v55 = vadd.f32 %v121_v51, %v120_v54 }
  0x42   :  { %v123_v58 = vrot.slane %v122_v55, 4 }
  0x44   :  { %v124_v60 = vadd.f32 %v123_v58, %v122_v55 }
  0x46   :  { %v125_v63 = vrot.slane %v124_v60, 2 }
  0x48   :  { %v126_v0 = vadd.f32 %v125_v63, %v124_v60 }
  0x4a   :  { %v127_v7 = vrot.slane %v126_v0, 1 }
  0x4c   :  { %v128_v11 = vadd.f32 %v127_v7, %v126_v0 }
  0x4e   :  { %v1327_v15 = vmul.f32 %v1324_v13, %v128_v11 }
  0x50   :  { %v1331_v18 = vsub.f32 %v1097_v2, %v1327_v15  ;;  %v1335_v20 = vsub.f32 %v1102_v3, %v1327_v15  ;;  %v1339_v22 = vsub.f32 %v1110_v5, %v1327_v15  ;;  %v1343_v24 = vsub.f32 %v1115_v6, %v1327_v15 }
  0x51   :  { %v1347_v27 = vsub.f32 %v1124_v9, %v1327_v15  ;;  %v1357_v5 = vsub.f32 %v1136_v14, %v1327_v15  ;;  %v1363_v9 = vsub.f32 %v1143_v17, %v1327_v15  ;;  %v1372_v14 = vsub.f32 %v1148_v19, %v1327_v15 }
  0x52   :  { %v169_v2 = vmul.f32 %v1331_v18, %v1331_v18  ;;  %v170_v28 = vmul.f32 %v1335_v20, %v1335_v20  ;;  %v171_v3 = vmul.f32 %v1339_v22, %v1339_v22  ;;  %v172_v6 = vmul.f32 %v1343_v24, %v1343_v24 }
  0x53   :  { %v173_v31 = vmul.f32 %v1347_v27, %v1347_v27  ;;  %v174_v42 = vmul.f32 %v1357_v5, %v1357_v5  ;;  %v1379_v46 = vsub.f32 %v1157_v23, %v1327_v15  ;;  %v175_v48 = vmul.f32 %v1363_v9, %v1363_v9 }
  0x54   :  { %v201_v33 = vsel %vm59_vm0, %v169_v2, 0.0  ;;  %v202_v36 = vsel %vm59_vm0, %v170_v28, 0.0  ;;  %v204_v37 = vsel %vm59_vm0, %v171_v3, 0.0  ;;  %v206_v17 = vsel %vm59_vm0, %v172_v6, 0.0 }
  0x55   :  { %v203_v40 = vadd.f32 %v202_v36, %v201_v33  ;;  %v208_v49 = vsel %vm59_vm0, %v173_v31, 0.0  ;;  %v1386_v19 = vsub.f32 %v1164_v26, %v1327_v15  ;;  %v176_v52 = vmul.f32 %v1372_v14, %v1372_v14 }
  0x56   :  { %v210_v54 = vsel %vm59_vm0, %v174_v42, 0.0  ;;  %v1393_v23 = vsub.f32 %v1171_v29, %v1327_v15  ;;  %v177_v57 = vmul.f32 %v1379_v46, %v1379_v46  ;;  %v212_v58 = vsel %vm59_vm0, %v175_v48, 0.0 }
  0x57   :  { %v205_v43 = vadd.f32 %v204_v37, %v203_v40  ;;  %v1400_v26 = vsub.f32 %v1178_v32, %v1327_v15  ;;  %v178_v61 = vmul.f32 %v1386_v19, %v1386_v19  ;;  %v214_v63 = vsel %vm59_vm0, %v176_v52, 0.0 }
  0x58   :  { %v1407_v29 = vsub.f32 %v1185_v35, %v1327_v15  ;;  %v179_v4 = vmul.f32 %v1393_v23, %v1393_v23  ;;  %v216_v7 = vsel %vm59_vm0, %v177_v57, 0.0  ;;  %v1414_v32 = vsub.f32 %v1192_v38, %v1327_v15 }
  0x59   :  { %v207_v51 = vadd.f32 %v206_v17, %v205_v43  ;;  %v180_v11 = vmul.f32 %v1400_v26, %v1400_v26  ;;  %v218_v2 = vsel %vm59_vm0, %v178_v61, 0.0  ;;  %v1421_v35 = vsub.f32 %v1199_v41, %v1327_v15 }
  0x5a   :  { %v181_v3 = vmul.f32 %v1407_v29, %v1407_v29  ;;  %v220_v6 = vsel %vm59_vm0, %v179_v4, 0.0  ;;  %v1428_v38 = vsub.f32 %v1206_v44, %v1327_v15  ;;  %v182_v33 = vmul.f32 %v1414_v32, %v1414_v32 }
  0x5b   :  { %v209_v55 = vadd.f32 %v208_v49, %v207_v51  ;;  %v222_v36 = vsel %vm59_vm0, %v180_v11, 0.0  ;;  %v1435_v41 = vsub.f32 %v1213_v47, %v1327_v15  ;;  %v183_v40 = vmul.f32 %v1421_v35, %v1421_v35 }
  0x5c   :  { %v224_v42 = vsel %vm59_vm0, %v181_v3, 0.0  ;;  %v1442_v44 = vsub.f32 %v1220_v50, %v1327_v15  ;;  %v184_v43 = vmul.f32 %v1428_v38, %v1428_v38  ;;  %v226_v48 = vsel %vm59_vm0, %v182_v33, 0.0 }
  0x5d   :  { %v211_v60 = vadd.f32 %v210_v54, %v209_v55  ;;  %v1449_v47 = vsub.f32 %v1227_v53, %v1327_v15  ;;  %v185_v51 = vmul.f32 %v1435_v41, %v1435_v41  ;;  %v228_v52 = vsel %vm59_vm0, %v183_v40, 0.0 }
  0x5e   :  { %v1456_v50 = vsub.f32 %v1234_v56, %v1327_v15  ;;  %v186_v55 = vmul.f32 %v1442_v44, %v1442_v44  ;;  %v230_v57 = vsel %vm59_vm0, %v184_v43, 0.0  ;;  %v1463_v53 = vsub.f32 %v1241_v59, %v1327_v15 }
  0x5f   :  { %v213_v0 = vadd.f32 %v212_v58, %v211_v60  ;;  %v187_v60 = vmul.f32 %v1449_v47, %v1449_v47  ;;  %v232_v61 = vsel %vm59_vm0, %v185_v51, 0.0  ;;  %v1470_v56 = vsub.f32 %v1248_v62, %v1327_v15 }
  0x60   :  { %v234_v4 = vsel %vm59_vm0, %v186_v55, 0.0  ;;  %v1477_v59 = vsub.f32 %v1255_v1, %v1327_v15  ;;  %v1484_v62 = vsub.f32 %v1262_v8, %v1327_v15  ;;  %v1491_v1 = vsub.f32 %v1269_v12, %v1327_v15 }
  0x61   :  { %v215_v10 = vadd.f32 %v214_v63, %v213_v0  ;;  %v188_v0 = vmul.f32 %v1456_v50, %v1456_v50  ;;  %v236_v11 = vsel %vm59_vm0, %v187_v60, 0.0  ;;  %v1498_v8 = vsub.f32 %v1276_v16, %v1327_v15 }
  0x62   :  { %v1505_v12 = vsub.f32 %v1283_v21, %v1327_v15  ;;  %v1512_v16 = vsub.f32 %v1290_v25, %v1327_v15  ;;  %v1519_v21 = vsub.f32 %v1297_v30, %v1327_v15  ;;  %v1526_v25 = vsub.f32 %v1304_v34, %v1327_v15 }
  0x63   :  { %v217_v28 = vadd.f32 %v216_v7, %v215_v10  ;;  %v189_v10 = vmul.f32 %v1463_v53, %v1463_v53  ;;  %v238_v3 = vsel %vm59_vm0, %v188_v0, 0.0  ;;  %v1533_v30 = vsub.f32 %v1311_v39, %v1327_v15 }
  0x64   :  { %v1540_v34 = vsub.f32 %v1318_v45, %v1327_v15 }
  0x65   :  { %v219_v31 = vadd.f32 %v218_v2, %v217_v28  ;;  %v190_v28 = vmul.f32 %v1470_v56, %v1470_v56  ;;  %v240_v33 = vsel %vm59_vm0, %v189_v10, 0.0  ;;  %v199_v39 = vmul.f32 %v1533_v30, %v1533_v30 }
  0x67   :  { %v221_v37 = vadd.f32 %v220_v6, %v219_v31  ;;  %v191_v31 = vmul.f32 %v1477_v59, %v1477_v59  ;;  %v242_v40 = vsel %vm59_vm0, %v190_v28, 0.0  ;;  %v260_v45 = vsel %vm59_vm0, %v199_v39, 0.0 }
  0x69   :  { %v223_v17 = vadd.f32 %v222_v36, %v221_v37  ;;  %v192_v37 = vmul.f32 %v1484_v62, %v1484_v62  ;;  %v244_v43 = vsel %vm59_vm0, %v191_v31, 0.0 }
  0x6b   :  { %v225_v49 = vadd.f32 %v224_v42, %v223_v17  ;;  %v193_v17 = vmul.f32 %v1491_v1, %v1491_v1  ;;  %v246_v51 = vsel %vm59_vm0, %v192_v37, 0.0 }
  0x6d   :  { %v227_v54 = vadd.f32 %v226_v48, %v225_v49  ;;  %v194_v49 = vmul.f32 %v1498_v8, %v1498_v8  ;;  %v248_v55 = vsel %vm59_vm0, %v193_v17, 0.0 }
  0x6f   :  { %v229_v58 = vadd.f32 %v228_v52, %v227_v54  ;;  %v195_v54 = vmul.f32 %v1505_v12, %v1505_v12  ;;  %v250_v60 = vsel %vm59_vm0, %v194_v49, 0.0 }
  0x71   :  { %v231_v63 = vadd.f32 %v230_v57, %v229_v58  ;;  %v196_v58 = vmul.f32 %v1512_v16, %v1512_v16  ;;  %v252_v0 = vsel %vm59_vm0, %v195_v54, 0.0 }
  0x73   :  { %v233_v7 = vadd.f32 %v232_v61, %v231_v63  ;;  %v197_v63 = vmul.f32 %v1519_v21, %v1519_v21  ;;  %v254_v10 = vsel %vm59_vm0, %v196_v58, 0.0 }
  0x75   :  { %v235_v2 = vadd.f32 %v234_v4, %v233_v7  ;;  %v198_v7 = vmul.f32 %v1526_v25, %v1526_v25 }
  0x77   :  { %v237_v6 = vadd.f32 %v236_v11, %v235_v2  ;;  %v256_v2 = vsel %vm59_vm0, %v197_v63, 0.0 }
  0x79   :  { %v239_v36 = vadd.f32 %v238_v3, %v237_v6  ;;  %v200_v3 = vmul.f32 %v1540_v34, %v1540_v34  ;;  %v258_v6 = vsel %vm59_vm0, %v198_v7, 0.0 }
  0x7b   :  { %v241_v42 = vadd.f32 %v240_v33, %v239_v36  ;;  %v262_v33 = vsel %vm59_vm0, %v200_v3, 0.0 }
  0x7d   :  { %v243_v48 = vadd.f32 %v242_v40, %v241_v42 }
  0x7f   :  { %v245_v52 = vadd.f32 %v244_v43, %v243_v48 }
  0x81   :  { %v247_v57 = vadd.f32 %v246_v51, %v245_v52 }
  0x83   :  { %v249_v61 = vadd.f32 %v248_v55, %v247_v57 }
  0x85   :  { %v251_v4 = vadd.f32 %v250_v60, %v249_v61  ;;  %v271_v61 = vld [vmem:[%s1814_s1] sm:$0x1] }
  0x87   :  { %v253_v11 = vadd.f32 %v252_v0, %v251_v4 }
  0x89   :  { %v255_v28 = vadd.f32 %v254_v10, %v253_v11 }
  0x8b   :  { %v257_v31 = vadd.f32 %v256_v2, %v255_v28 }
  0x8d   :  { %v259_v15 = vadd.f32 %v258_v6, %v257_v31 }
  0x8f   :  { %v261_v36 = vadd.f32 %v260_v45, %v259_v15 }
  0x91   :  { %v263_v37 = vadd.f32 %v262_v33, %v261_v36 }
  0x93   :  { %v264_v40 = vrot.slane %v263_v37, 4 }
  0x95   :  { %v265_v42 = vadd.f32 %v264_v40, %v263_v37 }
  0x97   :  { %v266_v17 = vrot.slane %v265_v42, 2 }
  0x99   :  { %v267_v43 = vadd.f32 %v266_v17, %v265_v42 }
  0x9b   :  { %v268_v48 = vrot.slane %v267_v43, 1 }
  0x9d   :  { %v269_v49 = vadd.f32 %v268_v48, %v267_v43 }
  0x9f   :  { %v270_v51 = vmul.f32 %v269_v49, %v1324_v13  ;;  %v1562_v13 = vld [vmem:[%s1815_s2] ss:$0 sm:$0xff] }
  0xa1   :  { %v272_v52 = vadd.f32 1e-05, %v270_v51 }
  0xa3   :  { %1016 = vrsqrt.f32 %v272_v52  ;;  %vm279_vm2 = vweird.f32 %v272_v52 }
  0xa9   :  { %v1017_v54 = vpop.eup %1016 }
  0xaa   :  { %v274_v55 = vmul.f32 %v1017_v54, %v272_v52  ;;  %vm280_vm3 = vweird.f32 %v1017_v54 }
  0xab   :  { %vm281_vm4 = vmor %vm279_vm2, %vm280_vm3 }
  0xac   :  { %v275_v57 = vmul.f32 %v1017_v54, %v274_v55 }
  0xae   :  { %v276_v58 = vmul.f32 0.5, %v275_v57 }
  0xb0   :  { %v277_v60 = vsub.f32 1.5, %v276_v58 }
  0xb2   :  { %v278_v63 = vmul.f32 %v1017_v54, %v277_v60 }
  0xb4   :  { %v282_v0 = vsel %vm281_vm4, %v1017_v54, %v278_v63 }
  0xb5   :  { %v283_v4 = vmul.f32 %v282_v0, %v271_v61 }
  0xb7   :  { %v1557_v7 = vperm.slane %v283_v4, 0  ;;  %v670_v4 = vld [vmem:[%s1818_s5 + $0x10] sm:$0xff] }
  0xb9   :  { %v303_v10 = vmul.f32 %v1557_v7, %v1435_v41  ;;  %v287_v11 = vmul.f32 %v1557_v7, %v1331_v18  ;;  %v304_v28 = vmul.f32 %v1557_v7, %v1442_v44  ;;  %v288_v3 = vmul.f32 %v1557_v7, %v1335_v20 }
  0xba   :  { %v305_v18 = vmul.f32 %v1557_v7, %v1449_v47  ;;  %v289_v31 = vmul.f32 %v1557_v7, %v1339_v22  ;;  %v306_v20 = vmul.f32 %v1557_v7, %v1456_v50  ;;  %v290_v15 = vmul.f32 %v1557_v7, %v1343_v24 }
  0xbb   :  { %v339_v39 = vadd.f32 %v1562_v13, %v303_v10  ;;  %v323_v2 = vadd.f32 %v1562_v13, %v287_v11  ;;  %v340_v6 = vadd.f32 %v1562_v13, %v304_v28  ;;  %v324_v41 = vadd.f32 %v1562_v13, %v288_v3 }
  0xbc   :  { %v341_v44 = vadd.f32 %v1562_v13, %v305_v18  ;;  %v325_v45 = vadd.f32 %v1562_v13, %v289_v31  ;;  %v342_v47 = vadd.f32 %v1562_v13, %v306_v20  ;;  %v326_v33 = vadd.f32 %v1562_v13, %v290_v15  ;;  %v1707_v18 = vld [vmem:[%s1817_s4] ss:$0 sm:$0xff] }
  0xbd   :  { %951 = vmatmul.msk.f32.vlgmr.msra.gmra.mxu2 %vm59_vm0, %v339_v39  ;;  %935 = vmatmul.msk.f32.vlgmr.msra.gmra.mxu0 %vm59_vm0, %v323_v2  ;;  %v307_v22 = vmul.f32 %v1557_v7, %v1463_v53  ;;  %v291_v36 = vmul.f32 %v1557_v7, %v1347_v27  ;;  %v308_v24 = vmul.f32 %v1557_v7, %v1470_v56  ;;  %v669_v39 = vld [vmem:[%s1818_s5 + $0x8] sm:$0xff] }
  0xbe   :  { %v292_v40 = vmul.f32 %v1557_v7, %v1357_v5  ;;  %v309_v27 = vmul.f32 %v1557_v7, %v1477_v59  ;;  %v293_v17 = vmul.f32 %v1557_v7, %v1363_v9  ;;  %v310_v5 = vmul.f32 %v1557_v7, %v1484_v62 }
  0xbf   :  { %v343_v50 = vadd.f32 %v1562_v13, %v307_v22  ;;  %v327_v37 = vadd.f32 %v1562_v13, %v291_v36  ;;  %v344_v53 = vadd.f32 %v1562_v13, %v308_v24  ;;  %v294_v48 = vmul.f32 %v1557_v7, %v1372_v14 }
  0xc0   :  { %v328_v42 = vadd.f32 %v1562_v13, %v292_v40  ;;  %v345_v56 = vadd.f32 %v1562_v13, %v309_v27  ;;  %v329_v43 = vadd.f32 %v1562_v13, %v293_v17  ;;  %v346_v59 = vadd.f32 %v1562_v13, %v310_v5 }
  0xc1   :  { %v330_v49 = vadd.f32 %v1562_v13, %v294_v48  ;;  %v311_v9 = vmul.f32 %v1557_v7, %v1491_v1  ;;  %v295_v51 = vmul.f32 %v1557_v7, %v1379_v46  ;;  %v312_v14 = vmul.f32 %v1557_v7, %v1498_v8 }
  0xc2   :  { %v296_v54 = vmul.f32 %v1557_v7, %v1386_v19  ;;  %v313_v46 = vmul.f32 %v1557_v7, %v1505_v12  ;;  %v297_v57 = vmul.f32 %v1557_v7, %v1393_v23  ;;  %v314_v19 = vmul.f32 %v1557_v7, %v1512_v16  ;;  %v671_v16 = vld [vmem:[%s1818_s5 + $0x18] sm:$0xff] }
  0xc3   :  { %v347_v62 = vadd.f32 %v1562_v13, %v311_v9  ;;  %v331_v52 = vadd.f32 %v1562_v13, %v295_v51  ;;  %v348_v1 = vadd.f32 %v1562_v13, %v312_v14  ;;  %v298_v60 = vmul.f32 %v1557_v7, %v1400_v26  ;;  %1003 = vmatpush.msra.mxu3 %v671_v16 }
  0xc4   :  { %v332_v55 = vadd.f32 %v1562_v13, %v296_v54  ;;  %v349_v8 = vadd.f32 %v1562_v13, %v313_v46  ;;  %v333_v58 = vadd.f32 %v1562_v13, %v297_v57  ;;  %v350_v12 = vadd.f32 %v1562_v13, %v314_v19  ;;  %784 = vmatpush.msra.mxu1 %v671_v16 }
  0xc5   :  { %952 = vmatmul.msk.f32.gmra.mxu2 %vm59_vm0, %v340_v6  ;;  %936 = vmatmul.msk.f32.gmra.mxu0 %vm59_vm0, %v324_v41  ;;  %v334_v61 = vadd.f32 %v1562_v13, %v298_v60  ;;  %v315_v23 = vmul.f32 %v1557_v7, %v1519_v21  ;;  %v299_v63 = vmul.f32 %v1557_v7, %v1407_v29 }
  0xc6   :  { %v316_v21 = vmul.f32 %v1557_v7, %v1526_v25  ;;  %v300_v29 = vmul.f32 %v1557_v7, %v1414_v32  ;;  %1004 = vmatpush.msra.mxu3 %v670_v4  ;;  %785 = vmatpush.msra.mxu1 %v670_v4  ;;  %v668_v25 = vld [vmem:[%s1818_s5] sm:$0xff]  ;;  %v317_v32 = vmul.f32 %v1557_v7, %v1533_v30 }
  0xc7   :  { %v351_v26 = vadd.f32 %v1562_v13, %v315_v23  ;;  %v335_v0 = vadd.f32 %v1562_v13, %v299_v63  ;;  %v301_v2 = vmul.f32 %v1557_v7, %v1421_v35  ;;  %v318_v6 = vmul.f32 %v1557_v7, %v1540_v34 }
  0xc8   :  { %v352_v10 = vadd.f32 %v1562_v13, %v316_v21  ;;  %v336_v11 = vadd.f32 %v1562_v13, %v300_v29  ;;  %1005 = vmatpush.msra.mxu3 %v669_v39  ;;  %786 = vmatpush.msra.mxu1 %v669_v39  ;;  %v353_v28 = vadd.f32 %v1562_v13, %v317_v32 }
  0xc9   :  { %v337_v3 = vadd.f32 %v1562_v13, %v301_v2  ;;  %v302_v30 = vmul.f32 %v1557_v7, %v1428_v38  ;;  %v354_v41 = vadd.f32 %v1562_v13, %v318_v6 }
  0xca   :  { %1006 = vmatpush.msra.mxu3 %v668_v25  ;;  %787 = vmatpush.msra.mxu1 %v668_v25 }
  0xcb   :  { %v338_v35 = vadd.f32 %v1562_v13, %v302_v30 }
  0xcd   :  { %953 = vmatmul.msk.f32.gmra.mxu2 %vm59_vm0, %v341_v44  ;;  %937 = vmatmul.msk.f32.gmra.mxu0 %vm59_vm0, %v325_v45 }
  0xd5   :  { %954 = vmatmul.msk.f32.gmra.mxu2 %vm59_vm0, %v342_v47  ;;  %938 = vmatmul.msk.f32.gmra.mxu0 %vm59_vm0, %v326_v33 }
  0xdd   :  { %955 = vmatmul.msk.f32.gmra.mxu2 %vm59_vm0, %v343_v50  ;;  %939 = vmatmul.msk.f32.gmra.mxu0 %vm59_vm0, %v327_v37 }
  0xe5   :  { %956 = vmatmul.msk.f32.gmra.mxu2 %vm59_vm0, %v344_v53  ;;  %940 = vmatmul.msk.f32.gmra.mxu0 %vm59_vm0, %v328_v42 }
  0xed   :  { %957 = vmatmul.msk.f32.gmra.mxu2 %vm59_vm0, %v345_v56  ;;  %941 = vmatmul.msk.f32.gmra.mxu0 %vm59_vm0, %v329_v43 }
  0xf5   :  { %958 = vmatmul.msk.f32.gmra.mxu2 %vm59_vm0, %v346_v59  ;;  %942 = vmatmul.msk.f32.gmra.mxu0 %vm59_vm0, %v330_v49 }
  0xfd   :  { %959 = vmatmul.msk.f32.gmra.mxu2 %vm59_vm0, %v347_v62  ;;  %943 = vmatmul.msk.f32.gmra.mxu0 %vm59_vm0, %v331_v52 }
 0x105   :  { %960 = vmatmul.msk.f32.gmra.mxu2 %vm59_vm0, %v348_v1  ;;  %944 = vmatmul.msk.f32.gmra.mxu0 %vm59_vm0, %v332_v55 }
 0x10d   :  { %961 = vmatmul.msk.f32.gmra.mxu2 %vm59_vm0, %v349_v8  ;;  %945 = vmatmul.msk.f32.gmra.mxu0 %vm59_vm0, %v333_v58 }
 0x115   :  { %962 = vmatmul.msk.f32.gmra.mxu2 %vm59_vm0, %v350_v12  ;;  %946 = vmatmul.msk.f32.gmra.mxu0 %vm59_vm0, %v334_v61 }
 0x11d   :  { %963 = vmatmul.msk.f32.gmra.mxu2 %vm59_vm0, %v351_v26  ;;  %947 = vmatmul.msk.f32.gmra.mxu0 %vm59_vm0, %v335_v0 }
 0x125   :  { %964 = vmatmul.msk.f32.gmra.mxu2 %vm59_vm0, %v352_v10  ;;  %948 = vmatmul.msk.f32.gmra.mxu0 %vm59_vm0, %v336_v11 }
 0x12d   :  { %965 = vmatmul.msk.f32.gmra.mxu2 %vm59_vm0, %v353_v28  ;;  %949 = vmatmul.msk.f32.gmra.mxu0 %vm59_vm0, %v337_v3 }
 0x135   :  { %966 = vmatmul.msk.f32.gmra.mxu2 %vm59_vm0, %v354_v41  ;;  %950 = vmatmul.msk.f32.gmra.mxu0 %vm59_vm0, %v338_v35 }
 0x13a   :  { %v476_v31 = vpop.f32.mrf.mxu0 }
 0x13b   :  { %v477_v34 = vadd.f32 %v1707_v18, %v476_v31 }
 0x13d   :  { %v604_v44 = vmul.f32 0.01, %v477_v34  ;;  %vm572_vm5 = vcmp.gt.f32.partialorder %v477_v34, 0.0 }
 0x13f   :  { %v636_v45 = vsel %vm572_vm5, %v477_v34, %v604_v44 }
 0x140   :  { %v524_v38 = vpop.f32.mrf.mxu2  ;;  %967 = vmatmul.msk.f32.vlgmr.msra.gmra.mxu1 %vm59_vm0, %v636_v45 }
 0x141   :  { %v525_v7 = vadd.f32 %v1707_v18, %v524_v38 }
 0x142   :  { %v479_v13 = vpop.f32.mrf.mxu0 }
 0x143   :  { %v620_v20 = vmul.f32 0.01, %v525_v7  ;;  %vm588_vm6 = vcmp.gt.f32.partialorder %v525_v7, 0.0  ;;  %v480_v15 = vadd.f32 %v1707_v18, %v479_v13 }
 0x145   :  { %v652_v47 = vsel %vm588_vm6, %v525_v7, %v620_v20  ;;  %v605_v33 = vmul.f32 0.01, %v480_v15  ;;  %vm573_vm7 = vcmp.gt.f32.partialorder %v480_v15, 0.0 }
 0x146   :  { %983 = vmatmul.msk.f32.vlgmr.msra.gmra.mxu3 %vm59_vm0, %v652_v47 }
 0x147   :  { %v637_v22 = vsel %vm573_vm7, %v480_v15, %v605_v33 }
 0x148   :  { %v527_v36 = vpop.f32.mrf.mxu2  ;;  %968 = vmatmul.msk.f32.gmra.mxu1 %vm59_vm0, %v637_v22 }
 0x149   :  { %v528_v50 = vadd.f32 %v1707_v18, %v527_v36 }
 0x14a   :  { %v482_v37 = vpop.f32.mrf.mxu0 }
 0x14b   :  { %v621_v24 = vmul.f32 0.01, %v528_v50  ;;  %vm589_vm8 = vcmp.gt.f32.partialorder %v528_v50, 0.0  ;;  %v483_v40 = vadd.f32 %v1707_v18, %v482_v37 }
 0x14d   :  { %v653_v53 = vsel %vm589_vm8, %v528_v50, %v621_v24  ;;  %v606_v42 = vmul.f32 0.01, %v483_v40  ;;  %vm574_vm9 = vcmp.gt.f32.partialorder %v483_v40, 0.0 }
 0x14e   :  { %984 = vmatmul.msk.f32.gmra.mxu3 %vm59_vm0, %v653_v53 }
 0x14f   :  { %v638_v27 = vsel %vm574_vm9, %v483_v40, %v606_v42 }
 0x150   :  { %v530_v17 = vpop.f32.mrf.mxu2  ;;  %969 = vmatmul.msk.f32.gmra.mxu1 %vm59_vm0, %v638_v27 }
 0x151   :  { %v531_v56 = vadd.f32 %v1707_v18, %v530_v17 }
 0x152   :  { %v485_v43 = vpop.f32.mrf.mxu0 }
 0x153   :  { %v622_v5 = vmul.f32 0.01, %v531_v56  ;;  %vm590_vm10 = vcmp.gt.f32.partialorder %v531_v56, 0.0  ;;  %v486_v48 = vadd.f32 %v1707_v18, %v485_v43 }
 0x155   :  { %v654_v59 = vsel %vm590_vm10, %v531_v56, %v622_v5  ;;  %v607_v49 = vmul.f32 0.01, %v486_v48  ;;  %vm575_vm11 = vcmp.gt.f32.partialorder %v486_v48, 0.0 }
 0x156   :  { %985 = vmatmul.msk.f32.gmra.mxu3 %vm59_vm0, %v654_v59 }
 0x157   :  { %v639_v9 = vsel %vm575_vm11, %v486_v48, %v607_v49 }
 0x158   :  { %v533_v51 = vpop.f32.mrf.mxu2  ;;  %970 = vmatmul.msk.f32.gmra.mxu1 %vm59_vm0, %v639_v9 }
 0x159   :  { %v534_v62 = vadd.f32 %v1707_v18, %v533_v51 }
 0x15a   :  { %v488_v52 = vpop.f32.mrf.mxu0 }
 0x15b   :  { %v623_v14 = vmul.f32 0.01, %v534_v62  ;;  %vm591_vm12 = vcmp.gt.f32.partialorder %v534_v62, 0.0  ;;  %v489_v54 = vadd.f32 %v1707_v18, %v488_v52 }
 0x15d   :  { %v655_v1 = vsel %vm591_vm12, %v534_v62, %v623_v14  ;;  %v608_v55 = vmul.f32 0.01, %v489_v54  ;;  %vm576_vm13 = vcmp.gt.f32.partialorder %v489_v54, 0.0 }
 0x15e   :  { %986 = vmatmul.msk.f32.gmra.mxu3 %vm59_vm0, %v655_v1 }
 0x15f   :  { %v640_v46 = vsel %vm576_vm13, %v489_v54, %v608_v55 }
 0x160   :  { %v536_v57 = vpop.f32.mrf.mxu2  ;;  %971 = vmatmul.msk.f32.gmra.mxu1 %vm59_vm0, %v640_v46 }
 0x161   :  { %v537_v8 = vadd.f32 %v1707_v18, %v536_v57 }
 0x162   :  { %v491_v58 = vpop.f32.mrf.mxu0 }
 0x163   :  { %v624_v19 = vmul.f32 0.01, %v537_v8  ;;  %vm592_vm14 = vcmp.gt.f32.partialorder %v537_v8, 0.0  ;;  %v492_v60 = vadd.f32 %v1707_v18, %v491_v58 }
 0x165   :  { %v656_v12 = vsel %vm592_vm14, %v537_v8, %v624_v19  ;;  %v609_v61 = vmul.f32 0.01, %v492_v60  ;;  %vm577_vm15 = vcmp.gt.f32.partialorder %v492_v60, 0.0 }
 0x166   :  { %987 = vmatmul.msk.f32.gmra.mxu3 %vm59_vm0, %v656_v12 }
 0x167   :  { %v641_v23 = vsel %vm577_vm15, %v492_v60, %v609_v61 }
 0x168   :  { %v539_v63 = vpop.f32.mrf.mxu2  ;;  %972 = vmatmul.msk.f32.gmra.mxu1 %vm59_vm0, %v641_v23 }
 0x169   :  { %v540_v16 = vadd.f32 %v1707_v18, %v539_v63 }
 0x16a   :  { %v494_v26 = vpop.f32.mrf.mxu0 }
 0x16b   :  { %v625_v0 = vmul.f32 0.01, %v540_v16  ;;  %vm593_vm1 = vcmp.gt.f32.partialorder %v540_v16, 0.0  ;;  %v495_v21 = vadd.f32 %v1707_v18, %v494_v26 }
 0x16d   :  { %v657_v29 = vsel %vm593_vm1, %v540_v16, %v625_v0  ;;  %v610_v4 = vmul.f32 0.01, %v495_v21  ;;  %vm578_vm2 = vcmp.gt.f32.partialorder %v495_v21, 0.0 }
 0x16e   :  { %988 = vmatmul.msk.f32.gmra.mxu3 %vm59_vm0, %v657_v29 }
 0x16f   :  { %v642_v10 = vsel %vm578_vm2, %v495_v21, %v610_v4 }
 0x170   :  { %v542_v11 = vpop.f32.mrf.mxu2  ;;  %973 = vmatmul.msk.f32.gmra.mxu1 %vm59_vm0, %v642_v10 }
 0x171   :  { %v543_v39 = vadd.f32 %v1707_v18, %v542_v11 }
 0x172   :  { %v497_v25 = vpop.f32.mrf.mxu0 }
 0x173   :  { %v626_v32 = vmul.f32 0.01, %v543_v39  ;;  %vm594_vm3 = vcmp.gt.f32.partialorder %v543_v39, 0.0  ;;  %v498_v2 = vadd.f32 %v1707_v18, %v497_v25 }
 0x175   :  { %v658_v28 = vsel %vm594_vm3, %v543_v39, %v626_v32  ;;  %v611_v3 = vmul.f32 0.01, %v498_v2  ;;  %vm579_vm4 = vcmp.gt.f32.partialorder %v498_v2, 0.0 }
 0x176   :  { %989 = vmatmul.msk.f32.gmra.mxu3 %vm59_vm0, %v658_v28 }
 0x177   :  { %v643_v6 = vsel %vm579_vm4, %v498_v2, %v611_v3 }
 0x178   :  { %v545_v30 = vpop.f32.mrf.mxu2  ;;  %974 = vmatmul.msk.f32.gmra.mxu1 %vm59_vm0, %v643_v6 }
 0x179   :  { %v546_v41 = vadd.f32 %v1707_v18, %v545_v30 }
 0x17a   :  { %v500_v35 = vpop.f32.mrf.mxu0 }
 0x17b   :  { %v627_v31 = vmul.f32 0.01, %v546_v41  ;;  %vm595_vm5 = vcmp.gt.f32.partialorder %v546_v41, 0.0  ;;  %v501_v34 = vadd.f32 %v1707_v18, %v500_v35 }
 0x17d   :  { %v659_v44 = vsel %vm595_vm5, %v546_v41, %v627_v31  ;;  %v612_v45 = vmul.f32 0.01, %v501_v34  ;;  %vm580_vm6 = vcmp.gt.f32.partialorder %v501_v34, 0.0  ;;  %v1775_v31 = vld [vmem:[%s1819_s6] ss:$0 sm:$0xff]  ;;  %s1045_s6 = smov [#allocation2]  }
 0x17e   :  { %990 = vmatmul.msk.f32.gmra.mxu3 %vm59_vm0, %v659_v44  ;;  %s921_s12 = sshll.u32 %s1045_s6, 4  ;;  %s922_s12 = int_to_ptr.vmem [resolvable:$true] %s921_s12 }
 0x17f   :  { %v644_v38 = vsel %vm580_vm6, %v501_v34, %v612_v45 }
 0x180   :  { %v548_v7 = vpop.f32.mrf.mxu2  ;;  %975 = vmatmul.msk.f32.gmra.mxu1 %vm59_vm0, %v644_v38 }
 0x181   :  { %v549_v13 = vadd.f32 %v1707_v18, %v548_v7 }
 0x182   :  { %v503_v20 = vpop.f32.mrf.mxu0 }
 0x183   :  { %v628_v15 = vmul.f32 0.01, %v549_v13  ;;  %vm596_vm7 = vcmp.gt.f32.partialorder %v549_v13, 0.0  ;;  %v504_v47 = vadd.f32 %v1707_v18, %v503_v20 }
 0x185   :  { %v660_v33 = vsel %vm596_vm7, %v549_v13, %v628_v15  ;;  %v613_v22 = vmul.f32 0.01, %v504_v47  ;;  %vm581_vm8 = vcmp.gt.f32.partialorder %v504_v47, 0.0 }
 0x186   :  { %991 = vmatmul.msk.f32.gmra.mxu3 %vm59_vm0, %v660_v33 }
 0x187   :  { %v645_v36 = vsel %vm581_vm8, %v504_v47, %v613_v22 }
 0x188   :  { %v551_v50 = vpop.f32.mrf.mxu2  ;;  %976 = vmatmul.msk.f32.gmra.mxu1 %vm59_vm0, %v645_v36 }
 0x189   :  { %v552_v37 = vadd.f32 %v1707_v18, %v551_v50 }
 0x18a   :  { %v506_v24 = vpop.f32.mrf.mxu0 }
 0x18b   :  { %v629_v40 = vmul.f32 0.01, %v552_v37  ;;  %vm597_vm9 = vcmp.gt.f32.partialorder %v552_v37, 0.0  ;;  %v507_v53 = vadd.f32 %v1707_v18, %v506_v24 }
 0x18d   :  { %v661_v42 = vsel %vm597_vm9, %v552_v37, %v629_v40  ;;  %v614_v27 = vmul.f32 0.01, %v507_v53  ;;  %vm582_vm10 = vcmp.gt.f32.partialorder %v507_v53, 0.0 }
 0x18e   :  { %992 = vmatmul.msk.f32.gmra.mxu3 %vm59_vm0, %v661_v42 }
 0x18f   :  { %v646_v17 = vsel %vm582_vm10, %v507_v53, %v614_v27 }
 0x190   :  { %v554_v56 = vpop.f32.mrf.mxu2  ;;  %977 = vmatmul.msk.f32.gmra.mxu1 %vm59_vm0, %v646_v17 }
 0x191   :  { %v555_v43 = vadd.f32 %v1707_v18, %v554_v56 }
 0x192   :  { %v509_v5 = vpop.f32.mrf.mxu0 }
 0x193   :  { %v630_v48 = vmul.f32 0.01, %v555_v43  ;;  %vm598_vm11 = vcmp.gt.f32.partialorder %v555_v43, 0.0  ;;  %v510_v59 = vadd.f32 %v1707_v18, %v509_v5 }
 0x195   :  { %v662_v49 = vsel %vm598_vm11, %v555_v43, %v630_v48  ;;  %v615_v9 = vmul.f32 0.01, %v510_v59  ;;  %vm583_vm12 = vcmp.gt.f32.partialorder %v510_v59, 0.0 }
 0x196   :  { %993 = vmatmul.msk.f32.gmra.mxu3 %vm59_vm0, %v662_v49 }
 0x197   :  { %v647_v51 = vsel %vm583_vm12, %v510_v59, %v615_v9 }
 0x198   :  { %v557_v62 = vpop.f32.mrf.mxu2  ;;  %978 = vmatmul.msk.f32.gmra.mxu1 %vm59_vm0, %v647_v51 }
 0x199   :  { %v558_v52 = vadd.f32 %v1707_v18, %v557_v62 }
 0x19a   :  { %v512_v14 = vpop.f32.mrf.mxu0 }
 0x19b   :  { %v631_v54 = vmul.f32 0.01, %v558_v52  ;;  %vm599_vm13 = vcmp.gt.f32.partialorder %v558_v52, 0.0  ;;  %v513_v1 = vadd.f32 %v1707_v18, %v512_v14 }
 0x19d   :  { %v663_v55 = vsel %vm599_vm13, %v558_v52, %v631_v54  ;;  %v616_v46 = vmul.f32 0.01, %v513_v1  ;;  %vm584_vm14 = vcmp.gt.f32.partialorder %v513_v1, 0.0 }
 0x19e   :  { %994 = vmatmul.msk.f32.gmra.mxu3 %vm59_vm0, %v663_v55 }
 0x19f   :  { %v648_v57 = vsel %vm584_vm14, %v513_v1, %v616_v46 }
 0x1a0   :  { %v560_v8 = vpop.f32.mrf.mxu2  ;;  %979 = vmatmul.msk.f32.gmra.mxu1 %vm59_vm0, %v648_v57 }
 0x1a1   :  { %v561_v58 = vadd.f32 %v1707_v18, %v560_v8 }
 0x1a2   :  { %v515_v19 = vpop.f32.mrf.mxu0 }
 0x1a3   :  { %v632_v60 = vmul.f32 0.01, %v561_v58  ;;  %vm600_vm15 = vcmp.gt.f32.partialorder %v561_v58, 0.0  ;;  %v516_v12 = vadd.f32 %v1707_v18, %v515_v19 }
 0x1a5   :  { %v664_v61 = vsel %vm600_vm15, %v561_v58, %v632_v60  ;;  %v617_v23 = vmul.f32 0.01, %v516_v12  ;;  %vm585_vm1 = vcmp.gt.f32.partialorder %v516_v12, 0.0 }
 0x1a6   :  { %995 = vmatmul.msk.f32.gmra.mxu3 %vm59_vm0, %v664_v61 }
 0x1a7   :  { %v649_v63 = vsel %vm585_vm1, %v516_v12, %v617_v23 }
 0x1a8   :  { %v563_v16 = vpop.f32.mrf.mxu2  ;;  %980 = vmatmul.msk.f32.gmra.mxu1 %vm59_vm0, %v649_v63 }
 0x1a9   :  { %v564_v26 = vadd.f32 %v1707_v18, %v563_v16 }
 0x1aa   :  { %v518_v0 = vpop.f32.mrf.mxu0 }
 0x1ab   :  { %v633_v21 = vmul.f32 0.01, %v564_v26  ;;  %vm601_vm2 = vcmp.gt.f32.partialorder %v564_v26, 0.0  ;;  %v519_v29 = vadd.f32 %v1707_v18, %v518_v0 }
 0x1ad   :  { %v665_v4 = vsel %vm601_vm2, %v564_v26, %v633_v21  ;;  %v618_v10 = vmul.f32 0.01, %v519_v29  ;;  %vm586_vm3 = vcmp.gt.f32.partialorder %v519_v29, 0.0 }
 0x1ae   :  { %996 = vmatmul.msk.f32.gmra.mxu3 %vm59_vm0, %v665_v4 }
 0x1af   :  { %v650_v11 = vsel %vm586_vm3, %v519_v29, %v618_v10 }
 0x1b0   :  { %v566_v39 = vpop.f32.mrf.mxu2  ;;  %981 = vmatmul.msk.f32.gmra.mxu1 %vm59_vm0, %v650_v11 }
 0x1b1   :  { %v567_v25 = vadd.f32 %v1707_v18, %v566_v39 }
 0x1b2   :  { %v521_v32 = vpop.f32.mrf.mxu0 }
 0x1b3   :  { %v634_v2 = vmul.f32 0.01, %v567_v25  ;;  %vm602_vm4 = vcmp.gt.f32.partialorder %v567_v25, 0.0  ;;  %v522_v28 = vadd.f32 %v1707_v18, %v521_v32 }
 0x1b5   :  { %v666_v3 = vsel %vm602_vm4, %v567_v25, %v634_v2  ;;  %v619_v6 = vmul.f32 0.01, %v522_v28  ;;  %vm587_vm5 = vcmp.gt.f32.partialorder %v522_v28, 0.0 }
 0x1b6   :  { %997 = vmatmul.msk.f32.gmra.mxu3 %vm59_vm0, %v666_v3 }
 0x1b7   :  { %v651_v30 = vsel %vm587_vm5, %v522_v28, %v619_v6 }
 0x1b8   :  { %v569_v41 = vpop.f32.mrf.mxu2  ;;  %982 = vmatmul.msk.f32.gmra.mxu1 %vm59_vm0, %v651_v30 }
 0x1b9   :  { %v570_v35 = vadd.f32 %v1707_v18, %v569_v41 }
 0x1bb   :  { %v635_v34 = vmul.f32 0.01, %v570_v35  ;;  %vm603_vm6 = vcmp.gt.f32.partialorder %v570_v35, 0.0 }
 0x1bd   :  { %v667_v44 = vsel %vm603_vm6, %v570_v35, %v635_v34  ;;  %v789_v45 = vpop.f32.mrf.mxu1 }
 0x1be   :  { %998 = vmatmul.msk.f32.gmra.mxu3 %vm59_vm0, %v667_v44  ;;  %v790_v38 = vadd.f32 %v1775_v31, %v789_v45 }
 0x1c0   :  { %885 = vst [vmem:[#allocation2] sm:$0xff] %v790_v38 }
 0x1c5   :  { %v792_v7 = vpop.f32.mrf.mxu1 }
 0x1c6   :  { %v793_v13 = vadd.f32 %v1775_v31, %v792_v7 }
 0x1c8   :  { %886 = vst [vmem:[#allocation2 + $0x8] sm:$0xff] %v793_v13 }
 0x1c9   :  { %v837_v20 = vpop.f32.mrf.mxu3 }
 0x1ca   :  { %v838_v18 = vadd.f32 %v1775_v31, %v837_v20 }
 0x1cc   :  { %901 = vst [vmem:[#allocation2 + $0x80] sm:$0xff] %v838_v18 }
 0x1cd   :  { %v795_v15 = vpop.f32.mrf.mxu1 }
 0x1ce   :  { %v796_v47 = vadd.f32 %v1775_v31, %v795_v15 }
 0x1d0   :  { %887 = vst [vmem:[#allocation2 + $0x10] sm:$0xff] %v796_v47 }
 0x1d1   :  { %v840_v33 = vpop.f32.mrf.mxu3 }
 0x1d2   :  { %v841_v22 = vadd.f32 %v1775_v31, %v840_v33 }
 0x1d4   :  { %902 = vst [vmem:[#allocation2 + $0x88] sm:$0xff] %v841_v22 }
 0x1d5   :  { %v798_v36 = vpop.f32.mrf.mxu1 }
 0x1d6   :  { %v799_v50 = vadd.f32 %v1775_v31, %v798_v36 }
 0x1d8   :  { %888 = vst [vmem:[#allocation2 + $0x18] sm:$0xff] %v799_v50 }
 0x1d9   :  { %v843_v37 = vpop.f32.mrf.mxu3 }
 0x1da   :  { %v844_v24 = vadd.f32 %v1775_v31, %v843_v37 }
 0x1dc   :  { %903 = vst [vmem:[#allocation2 + $0x90] sm:$0xff] %v844_v24 }
 0x1dd   :  { %v801_v40 = vpop.f32.mrf.mxu1 }
 0x1de   :  { %v802_v53 = vadd.f32 %v1775_v31, %v801_v40 }
 0x1e0   :  { %889 = vst [vmem:[#allocation2 + $0x20] sm:$0xff] %v802_v53 }
 0x1e1   :  { %v846_v42 = vpop.f32.mrf.mxu3 }
 0x1e2   :  { %v847_v27 = vadd.f32 %v1775_v31, %v846_v42 }
 0x1e4   :  { %904 = vst [vmem:[#allocation2 + $0x98] sm:$0xff] %v847_v27 }
 0x1e5   :  { %v804_v17 = vpop.f32.mrf.mxu1 }
 0x1e6   :  { %v805_v56 = vadd.f32 %v1775_v31, %v804_v17 }
 0x1e8   :  { %890 = vst [vmem:[#allocation2 + $0x28] sm:$0xff] %v805_v56 }
 0x1e9   :  { %v849_v43 = vpop.f32.mrf.mxu3 }
 0x1ea   :  { %v850_v5 = vadd.f32 %v1775_v31, %v849_v43 }
 0x1ec   :  { %905 = vst [vmem:[#allocation2 + $0xa0] sm:$0xff] %v850_v5 }
 0x1ed   :  { %v807_v48 = vpop.f32.mrf.mxu1 }
 0x1ee   :  { %v808_v59 = vadd.f32 %v1775_v31, %v807_v48 }
 0x1f0   :  { %891 = vst [vmem:[#allocation2 + $0x30] sm:$0xff] %v808_v59 }
 0x1f1   :  { %v852_v49 = vpop.f32.mrf.mxu3 }
 0x1f2   :  { %v853_v9 = vadd.f32 %v1775_v31, %v852_v49 }
 0x1f4   :  { %906 = vst [vmem:[#allocation2 + $0xa8] sm:$0xff] %v853_v9 }
 0x1f5   :  { %v810_v51 = vpop.f32.mrf.mxu1 }
 0x1f6   :  { %v811_v62 = vadd.f32 %v1775_v31, %v810_v51 }
 0x1f8   :  { %892 = vst [vmem:[#allocation2 + $0x38] sm:$0xff] %v811_v62 }
 0x1f9   :  { %v855_v52 = vpop.f32.mrf.mxu3 }
 0x1fa   :  { %v856_v14 = vadd.f32 %v1775_v31, %v855_v52 }
 0x1fc   :  { %907 = vst [vmem:[#allocation2 + $0xb0] sm:$0xff] %v856_v14 }
 0x1fd   :  { %v813_v54 = vpop.f32.mrf.mxu1 }
 0x1fe   :  { %v814_v1 = vadd.f32 %v1775_v31, %v813_v54 }
 0x200   :  { %893 = vst [vmem:[#allocation2 + $0x40] sm:$0xff] %v814_v1 }
 0x201   :  { %v858_v55 = vpop.f32.mrf.mxu3 }
 0x202   :  { %v859_v46 = vadd.f32 %v1775_v31, %v858_v55 }
 0x204   :  { %908 = vst [vmem:[#allocation2 + $0xb8] sm:$0xff] %v859_v46 }
 0x205   :  { %v816_v57 = vpop.f32.mrf.mxu1 }
 0x206   :  { %v817_v8 = vadd.f32 %v1775_v31, %v816_v57 }
 0x208   :  { %894 = vst [vmem:[#allocation2 + $0x48] sm:$0xff] %v817_v8 }
 0x209   :  { %v861_v58 = vpop.f32.mrf.mxu3 }
 0x20a   :  { %v862_v19 = vadd.f32 %v1775_v31, %v861_v58 }
 0x20c   :  { %909 = vst [vmem:[#allocation2 + $0xc0] sm:$0xff] %v862_v19 }
 0x20d   :  { %v819_v60 = vpop.f32.mrf.mxu1 }
 0x20e   :  { %v820_v12 = vadd.f32 %v1775_v31, %v819_v60 }
 0x210   :  { %895 = vst [vmem:[#allocation2 + $0x50] sm:$0xff] %v820_v12 }
 0x211   :  { %v864_v61 = vpop.f32.mrf.mxu3 }
 0x212   :  { %v865_v23 = vadd.f32 %v1775_v31, %v864_v61 }
 0x214   :  { %910 = vst [vmem:[#allocation2 + $0xc8] sm:$0xff] %v865_v23 }
 0x215   :  { %v822_v63 = vpop.f32.mrf.mxu1 }
 0x216   :  { %v823_v16 = vadd.f32 %v1775_v31, %v822_v63 }
 0x218   :  { %896 = vst [vmem:[#allocation2 + $0x58] sm:$0xff] %v823_v16 }
 0x219   :  { %v867_v26 = vpop.f32.mrf.mxu3 }
 0x21a   :  { %v868_v0 = vadd.f32 %v1775_v31, %v867_v26 }
 0x21c   :  { %911 = vst [vmem:[#allocation2 + $0xd0] sm:$0xff] %v868_v0 }
 0x21d   :  { %v825_v21 = vpop.f32.mrf.mxu1 }
 0x21e   :  { %v826_v29 = vadd.f32 %v1775_v31, %v825_v21 }
 0x220   :  { %897 = vst [vmem:[#allocation2 + $0x60] sm:$0xff] %v826_v29 }
 0x221   :  { %v870_v4 = vpop.f32.mrf.mxu3 }
 0x222   :  { %v871_v10 = vadd.f32 %v1775_v31, %v870_v4 }
 0x224   :  { %912 = vst [vmem:[#allocation2 + $0xd8] sm:$0xff] %v871_v10 }
 0x225   :  { %v828_v11 = vpop.f32.mrf.mxu1 }
 0x226   :  { %v829_v39 = vadd.f32 %v1775_v31, %v828_v11 }
 0x228   :  { %898 = vst [vmem:[#allocation2 + $0x68] sm:$0xff] %v829_v39 }
 0x229   :  { %v873_v25 = vpop.f32.mrf.mxu3 }
 0x22a   :  { %v874_v32 = vadd.f32 %v1775_v31, %v873_v25 }
 0x22c   :  { %913 = vst [vmem:[#allocation2 + $0xe0] sm:$0xff] %v874_v32 }
 0x22d   :  { %v831_v2 = vpop.f32.mrf.mxu1 }
 0x22e   :  { %v832_v28 = vadd.f32 %v1775_v31, %v831_v2 }
 0x230   :  { %899 = vst [vmem:[#allocation2 + $0x70] sm:$0xff] %v832_v28 }
 0x231   :  { %v876_v3 = vpop.f32.mrf.mxu3 }
 0x232   :  { %v877_v6 = vadd.f32 %v1775_v31, %v876_v3 }
 0x234   :  { %914 = vst [vmem:[#allocation2 + $0xe8] sm:$0xff] %v877_v6 }
 0x235   :  { %v834_v30 = vpop.f32.mrf.mxu1 }
 0x236   :  { %v835_v41 = vadd.f32 %v1775_v31, %v834_v30 }
 0x238   :  { %900 = vst [vmem:[#allocation2 + $0x78] sm:$0xff] %v835_v41 }
 0x239   :  { %v879_v35 = vpop.f32.mrf.mxu3 }
 0x23a   :  { %v880_v34 = vadd.f32 %v1775_v31, %v879_v35 }
 0x23c   :  { %915 = vst [vmem:[#allocation2 + $0xf0] sm:$0xff] %v880_v34 }
 0x241   :  { %v882_v44 = vpop.f32.mrf.mxu3 }
 0x242   :  { %v883_v45 = vadd.f32 %v1775_v31, %v882_v44 }
 0x244   :  { %916 = vst [vmem:[#allocation2 + $0xf8] sm:$0xff] %v883_v45 }
 0x245   :  { %929 = dma.vmem_to_hbm [thread:$0]  %s922_s12, 4096, %s924_s15, [#allocation3], %s1046_s16, %s1046_s16, %s1047_s17  }
 0x246   :  { %1042 = dma.done.wait [#allocation3], 4096  }
 0x247   :  { %1043 = vsyncadd [#allocation3], 4294963200 }
 0x248   :  { %934 = vsyncpa [#allocation3], 1 }

</bundles_post_ra>
